<compile_context>
chip_gen: v6e
topology: v6e:2x2x1
jax: 0.10.0
libtpu: 0.0.40
codegen_flags: <defaults>
</compile_context>

<pallas_src>
import math
import functools

import jax
import jax.numpy as jnp
from jax.experimental import pallas as pl
from jax.experimental.pallas import tpu as pltpu

LANE = 128


def _round_up(x, m):
    return (x + m - 1) // m * m


def _cdiv(a, b):
    return (a + b - 1) // b


def _mlp_kernel(x_ref, w1_ref, b1_ref, w2_ref, b2_ref, o_ref, *, out_dim):
    # x_ref:  [TB, D_in] f32    w1_ref: [D_in, H] bf16   b1_ref: [1, H] f32
    # w2_ref: [H, O_pad] bf16   b2_ref: [1, O_pad] f32   o_ref:  [TB, O_pad] bf16
    x = x_ref[...].astype(jnp.bfloat16)  # in-kernel cast: free VPU op under the DMA

    # fc1 + bias + ReLU  (bf16 MXU matmul, f32 accumulate; VPU epilogue in f32)
    h = jnp.dot(x, w1_ref[...], preferred_element_type=jnp.float32) + b1_ref[...]
    h = jnp.maximum(h, 0.0)

    # fc2 + bias.
    logits = jnp.dot(h.astype(w2_ref.dtype), w2_ref[...],
                     preferred_element_type=jnp.float32) + b2_ref[...]

    # Mask padded class columns in-kernel so they vanish from the softmax sum,
    # regardless of how W2/b2 were padded.
    col = jax.lax.broadcasted_iota(jnp.int32, logits.shape, 1)
    logits = jnp.where(col < out_dim, logits, jnp.float32(-1e30))

    # LogSoftmax over the lane (class) axis: max-shift (XLU) + exp/log (EUP).
    m = jnp.max(logits, axis=-1, keepdims=True)
    shifted = logits - m
    lse = jnp.log(jnp.sum(jnp.exp(shifted), axis=-1, keepdims=True))
    o_ref[...] = (shifted - lse).astype(o_ref.dtype)


@functools.partial(jax.jit, static_argnames=("out_dim", "block_b"))
def mlp_forward(x, w1, b1, w2, b2, *, out_dim, block_b=1024):
    """x: [B, D_in] f32; w1: [D_in, H] bf16; b1: [1, H] f32; w2: [H, O_pad] bf16;
    b2: [1, O_pad] f32. Returns [B, out_dim] f32 log-probabilities."""
    B, D_in = x.shape
    H = w1.shape[1]
    O_pad = w2.shape[1]

    # No-op casts if params are already stored in the right dtypes.
    w1b = w1.astype(jnp.bfloat16)
    w2b = w2.astype(jnp.bfloat16)
    b1f = b1.astype(jnp.float32).reshape(1, H)
    b2f = b2.astype(jnp.float32).reshape(1, O_pad)

    # Batch tile: aim for ~8 grid steps (keeps both v7x TCs busy), multiple of 16
    # (bf16 sublane packing on the output tile), capped at block_b. Tiny batches
    # collapse to one full-array block.
    tb = min(block_b, _round_up(_cdiv(B, 8), 16))
    tb = max(tb, 16)
    if tb >= B:
        tb = B
    grid = _cdiv(B, tb)  # ragged last block handled (masked) by Pallas; no jnp.pad.

    out = pl.pallas_call(
        functools.partial(_mlp_kernel, out_dim=out_dim),
        out_shape=jax.ShapeDtypeStruct((B, O_pad), jnp.bfloat16),
        grid_spec=pl.GridSpec(
            grid=(grid,),
            in_specs=[
                pl.BlockSpec((tb, D_in), lambda i: (i, 0)),   # x tile: pipelined over batch
                pl.BlockSpec((D_in, H), lambda i: (0, 0)),    # weights/biases VMEM-resident
                pl.BlockSpec((1, H), lambda i: (0, 0)),
                pl.BlockSpec((H, O_pad), lambda i: (0, 0)),
                pl.BlockSpec((1, O_pad), lambda i: (0, 0)),
            ],
            out_specs=pl.BlockSpec((tb, O_pad), lambda i: (i, 0)),
        ),
        compiler_params=pltpu.CompilerParams(
            dimension_semantics=("parallel",),  # megacore / 2-TC sharding on v7x
        ),
    )(x, w1b, b1f, w2b, b2f)

    return out[:, :out_dim].astype(jnp.float32)


def init_params(key, input_dim, hidden_dim, output_dim):
    k1, k2, k3, k4 = jax.random.split(key, 4)

    # fc1.weight: kaiming_normal_ (fan_in = input_dim, gain sqrt(2)) -> std = sqrt(2 / fan_in)
    std1 = math.sqrt(2.0 / input_dim)
    w1_t = jax.random.normal(k1, (hidden_dim, input_dim), jnp.float32) * std1  # [H, D_in]

    # fc1.bias: torch default uniform(-1/sqrt(fan_in), 1/sqrt(fan_in))
    bound1 = 1.0 / math.sqrt(input_dim)
    b1 = jax.random.uniform(k2, (hidden_dim,), jnp.float32, -bound1, bound1)

    # fc2.weight: xavier_uniform -> bound = sqrt(6 / (fan_in + fan_out))
    bound2 = math.sqrt(6.0 / (hidden_dim + output_dim))
    w2_t = jax.random.uniform(k3, (output_dim, hidden_dim), jnp.float32, -bound2, bound2)  # [O, H]

    # fc2.bias: torch default uniform(-1/sqrt(fan_in), 1/sqrt(fan_in))
    bound2b = 1.0 / math.sqrt(hidden_dim)
    b2 = jax.random.uniform(k4, (output_dim,), jnp.float32, -bound2b, bound2b)

    # Pre-transpose weights (y = x @ W.T + b == x @ W_t + b); store weights in bf16 once
    # so the forward pass never re-casts them.
    return (w1_t.T.astype(jnp.bfloat16), b1.reshape(1, -1),
            w2_t.T.astype(jnp.bfloat16), b2.reshape(1, -1))


def pad_output_params(w2, b2, lane=LANE):
    """Pad the class dim to a lane-dense multiple of 128 with zeros. The kernel masks the
    padded columns itself (iota >= out_dim), so no special bias convention is needed."""
    _, O = w2.shape
    o_pad = _round_up(O, lane)
    if o_pad == O:
        return w2, b2
    w2p = jnp.pad(w2, ((0, 0), (0, o_pad - O)))
    b2p = jnp.pad(b2, ((0, 0), (0, o_pad - O)))
    return w2p, b2p


if __name__ == "__main__":
    key = jax.random.PRNGKey(0)
    kx, kp = jax.random.split(key)

    B, D_in, H, O = 8, 32, 64, 10
    x = jax.random.normal(kx, (B, D_in), jnp.float32)
    w1, b1, w2, b2 = init_params(kp, D_in, H, O)
    w2p, b2p = pad_output_params(w2, b2)

    out = mlp_forward(x, w1, b1, w2p, b2p, out_dim=O)
    out = jax.block_until_ready(out)

    # Reference in plain JAX using the same bf16-operand / f32-accumulate math.
    xb = x.astype(jnp.bfloat16)
    h_ref = jnp.maximum(
        jnp.dot(xb, w1, preferred_element_type=jnp.float32) + b1.astype(jnp.float32), 0.0)
    logits_ref = jnp.dot(h_ref.astype(jnp.bfloat16), w2,
                         preferred_element_type=jnp.float32) + b2.astype(jnp.float32)
    ref = jax.nn.log_softmax(logits_ref, axis=1)

    assert out.shape == (B, O), f"bad output shape {out.shape}"
    assert bool(jnp.isfinite(out).all()), "non-finite values in output"
    # Output passes through a bf16 store (perf: halved HBM writeback), so tolerance ~3e-2.
    assert jnp.allclose(out, ref, atol=3e-2, rtol=3e-2), "mismatch vs reference"

    print("KERNEL_OK")
</pallas_src>

<mosaic_0001>
module attributes {stable_mosaic.version = 11 : i64} {
  func.func @_mlp_kernel(%arg0: i32, %arg1: memref<8x32xf32, #tpu.memory_space<vmem>>, %arg2: memref<32x64xbf16, #tpu.memory_space<vmem>>, %arg3: memref<1x64xf32, #tpu.memory_space<vmem>>, %arg4: memref<64x128xbf16, #tpu.memory_space<vmem>>, %arg5: memref<1x128xf32, #tpu.memory_space<vmem>>, %arg6: memref<8x128xbf16, #tpu.memory_space<vmem>>) attributes {dimension_semantics = [#tpu.dimension_semantics<parallel>], iteration_bounds = array<i64: 1>, scalar_prefetch = 0 : i64, scratch_operands = 0 : i64, tpu.core_type = #tpu.core_type<tc>, window_params = [{transform_indices = @transform_0, window_bounds = array<i64: 8, 32>}, {pipeline_mode = #tpu.pipeline_mode<synchronous>, transform_indices = @transform_1, window_bounds = array<i64: 32, 64>}, {pipeline_mode = #tpu.pipeline_mode<synchronous>, transform_indices = @transform_2, window_bounds = array<i64: 1, 64>}, {pipeline_mode = #tpu.pipeline_mode<synchronous>, transform_indices = @transform_3, window_bounds = array<i64: 64, 128>}, {pipeline_mode = #tpu.pipeline_mode<synchronous>, transform_indices = @transform_4, window_bounds = array<i64: 1, 128>}, {transform_indices = @transform_5, window_bounds = array<i64: 8, 128>}]} {
    %c0 = arith.constant 0 : index
    %c0_0 = arith.constant 0 : index
    %0 = vector.load %arg1[%c0, %c0_0] : memref<8x32xf32, #tpu.memory_space<vmem>>, vector<8x32xf32>
    %1 = arith.truncf %0 : vector<8x32xf32> to vector<8x32xbf16>
    %c0_1 = arith.constant 0 : index
    %c0_2 = arith.constant 0 : index
    %2 = vector.load %arg2[%c0_1, %c0_2] : memref<32x64xbf16, #tpu.memory_space<vmem>>, vector<32x64xbf16>
    %cst = arith.constant dense<0.000000e+00> : vector<8x64xf32>
    %3 = tpu.matmul %1, %2, %cst {dimension_numbers = #tpu.dot_dimension_numbers<[1], [0], [0], [1], [0, 0, 1, 1], [], []>} : vector<8x32xbf16>, vector<32x64xbf16>, vector<8x64xf32> -> vector<8x64xf32>
    %c0_3 = arith.constant 0 : index
    %c0_4 = arith.constant 0 : index
    %4 = vector.load %arg3[%c0_3, %c0_4] : memref<1x64xf32, #tpu.memory_space<vmem>>, vector<1x64xf32>
    %5 = vector.broadcast %4 : vector<1x64xf32> to vector<8x64xf32>
    %6 = arith.addf %3, %5 : vector<8x64xf32>
    %cst_5 = arith.constant 0.000000e+00 : f32
    %7 = vector.broadcast %cst_5 : f32 to vector<8x64xf32>
    %8 = arith.maximumf %6, %7 : vector<8x64xf32>
    %9 = arith.truncf %8 : vector<8x64xf32> to vector<8x64xbf16>
    %c0_6 = arith.constant 0 : index
    %c0_7 = arith.constant 0 : index
    %10 = vector.load %arg4[%c0_6, %c0_7] : memref<64x128xbf16, #tpu.memory_space<vmem>>, vector<64x128xbf16>
    %cst_8 = arith.constant dense<0.000000e+00> : vector<8x128xf32>
    %11 = tpu.matmul %9, %10, %cst_8 {dimension_numbers = #tpu.dot_dimension_numbers<[1], [0], [0], [1], [0, 0, 1, 1], [], []>} : vector<8x64xbf16>, vector<64x128xbf16>, vector<8x128xf32> -> vector<8x128xf32>
    %c0_9 = arith.constant 0 : index
    %c0_10 = arith.constant 0 : index
    %12 = vector.load %arg5[%c0_9, %c0_10] : memref<1x128xf32, #tpu.memory_space<vmem>>, vector<1x128xf32>
    %13 = vector.broadcast %12 : vector<1x128xf32> to vector<8x128xf32>
    %14 = arith.addf %11, %13 : vector<8x128xf32>
    %15 = tpu.iota {dimensions = array<i32: 1>} : vector<8x128xi32>
    %c10_i32 = arith.constant 10 : i32
    %16 = vector.broadcast %c10_i32 : i32 to vector<8x128xi32>
    %17 = arith.cmpi slt, %15, %16 : vector<8x128xi32>
    %cst_11 = arith.constant -1.000000e+30 : f32
    %18 = vector.broadcast %cst_11 : f32 to vector<8x128xf32>
    %19 = arith.select %17, %14, %18 : vector<8x128xi1>, vector<8x128xf32>
    %cst_12 = arith.constant dense<0xFF800000> : vector<8xf32>
    %20 = vector.multi_reduction <maximumf>, %19, %cst_12 [1] : vector<8x128xf32> to vector<8xf32>
    %21 = vector.shape_cast %20 : vector<8xf32> to vector<8x1xf32>
    %22 = vector.broadcast %21 : vector<8x1xf32> to vector<8x128xf32>
    %23 = arith.subf %19, %22 : vector<8x128xf32>
    %24 = math.exp %23 : vector<8x128xf32>
    %cst_13 = arith.constant dense<0.000000e+00> : vector<8xf32>
    %25 = vector.multi_reduction <add>, %24, %cst_13 [1] : vector<8x128xf32> to vector<8xf32>
    %26 = vector.shape_cast %25 : vector<8xf32> to vector<8x1xf32>
    %27 = math.log %26 : vector<8x1xf32>
    %28 = vector.broadcast %27 : vector<8x1xf32> to vector<8x128xf32>
    %29 = arith.subf %23, %28 : vector<8x128xf32>
    %30 = arith.truncf %29 : vector<8x128xf32> to vector<8x128xbf16>
    %c0_14 = arith.constant 0 : index
    %c0_15 = arith.constant 0 : index
    %31 = vector.load %arg6[%c0_14, %c0_15] : memref<8x128xbf16, #tpu.memory_space<vmem>>, vector<8x128xbf16>
    tpu.vector_store %arg6[%c0_14, %c0_15], %30 {strides = array<i32>} : memref<8x128xbf16, #tpu.memory_space<vmem>>, vector<8x128xbf16>,
    return
  }
  func.func @transform_0(%arg0: i32) -> (i32, i32) {
    %c0_i32 = arith.constant 0 : i32
    %c0_i32_0 = arith.constant 0 : i32
    return %arg0, %c0_i32 : i32, i32
  }
  func.func @transform_1(%arg0: i32) -> (i32, i32) {
    %c0_i32 = arith.constant 0 : i32
    %c0_i32_0 = arith.constant 0 : i32
    %c0_i32_1 = arith.constant 0 : i32
    return %c0_i32, %c0_i32_0 : i32, i32
  }
  func.func @transform_2(%arg0: i32) -> (i32, i32) {
    %c0_i32 = arith.constant 0 : i32
    %c0_i32_0 = arith.constant 0 : i32
    %c0_i32_1 = arith.constant 0 : i32
    return %c0_i32, %c0_i32_0 : i32, i32
  }
  func.func @transform_3(%arg0: i32) -> (i32, i32) {
    %c0_i32 = arith.constant 0 : i32
    %c0_i32_0 = arith.constant 0 : i32
    %c0_i32_1 = arith.constant 0 : i32
    return %c0_i32, %c0_i32_0 : i32, i32
  }
  func.func @transform_4(%arg0: i32) -> (i32, i32) {
    %c0_i32 = arith.constant 0 : i32
    %c0_i32_0 = arith.constant 0 : i32
    %c0_i32_1 = arith.constant 0 : i32
    return %c0_i32, %c0_i32_0 : i32, i32
  }
  func.func @transform_5(%arg0: i32) -> (i32, i32) {
    %c0_i32 = arith.constant 0 : i32
    %c0_i32_0 = arith.constant 0 : i32
    return %arg0, %c0_i32 : i32, i32
  }
}

</mosaic_0001>

<bundles_post_ra>
// kernel: mlp_forward.1
= control target key start
LH: loop header
LB: loop body
LE: loop exit
PB: predicated region body
PF: predicated region fallthrough
CT: control target
= control target key end

     0   :  { %10 = vsyncpa [#allocation3], 0  ;;  %s410_s0 = inlined_call_operand.hbm [shape: f32[8,32], index: 0, kind: input, shape index: {}]   ;;  %s411_s1 = inlined_call_operand.hbm [shape: bf16[32,64], index: 1, kind: input, shape index: {}]   ;;  %s412_s2 = inlined_call_operand.vmem [shape: f32[1,64], index: 2, kind: input, shape index: {}]   ;;  %s413_s3 = inlined_call_operand.hbm [shape: bf16[64,128], index: 3, kind: input, shape index: {}]   ;;  %s414_s4 = inlined_call_operand.vmem [shape: f32[1,128], index: 4, kind: input, shape index: {}]   ;;  %s415_s5 = inlined_call_operand.vmem [shape: bf16[8,128], index: 5, kind: output, shape index: {}]  }
   0x1   :  { %11 = vsyncpa [#allocation5], 0  ;;  %s355_s18 = smov [#allocation4]  }
   0x2   :  { %s27_s19 = sshll.u32 %s355_s18, 4  ;;  %s28_s19 = int_to_ptr.vmem [resolvable:$true] %s27_s19 }
   0x3   :  { %s299_s20 = scalar_lea.vmem %s28_s19, 256  ;;  %p304_p1 = scmp.lt.s32.totalorder %s28_s19, %s28_s19 }
   0x4   :  { %p300_p0 = scmp.ne.s32.totalorder %s28_s19, %s299_s20  ;;  %p305_p2 = scmp.lt.s32.totalorder %s299_s20, %s299_s20 }
   0x6   :  { %p306_p3 = por %p305_p2, %p304_p1 }
   0x8   :  { %p307_p4 = pnand %p306_p3, %p300_p0 }
   0xa   :  { %310 = shalt.err (!%p307_p4)
}
   0xb   :  { %s356_s21 = smov 64   ;;  %s357_s22 = smov 4  }
   0xc   :  { %33 = dma.hbm_to_vmem [thread:$0]  %s411_s1, 256, %s28_s19, [#allocation5], %s356_s21, %s356_s21, %s357_s22  }
   0xd   :  { %s358_s25 = smov [#allocation2]   ;;  %s359_s27 = smov [#allocation6]  }
   0xe   :  { %s18_s26 = sshll.u32 %s358_s25, 4  ;;  %s41_s28 = sshll.u32 %s359_s27, 4  ;;  %s19_s26 = int_to_ptr.vmem [resolvable:$true] %s18_s26  ;;  %s42_s28 = int_to_ptr.vmem [resolvable:$true] %s41_s28 }
   0xf   :  { %s319_s29 = scalar_lea.vmem %s19_s26, 128  ;;  %p324_p6 = scmp.lt.s32.totalorder %s19_s26, %s19_s26 }
  0x10   :  { %p320_p5 = scmp.ne.s32.totalorder %s19_s26, %s319_s29  ;;  %p325_p7 = scmp.lt.s32.totalorder %s319_s29, %s319_s29 }
  0x12   :  { %p326_p8 = por %p325_p7, %p324_p6 }
  0x14   :  { %p327_p9 = pnand %p326_p8, %p320_p5 }
  0x16   :  { %330 = shalt.err (!%p327_p9)
}
  0x17   :  { %21 = dma.hbm_to_vmem [thread:$0]  %s410_s0, 128, %s19_s26, [#allocation3]  }
  0x18   :  { %s339_s7 = scalar_lea.vmem %s42_s28, 512  ;;  %p344_p11 = scmp.lt.s32.totalorder %s42_s28, %s42_s28 }
  0x19   :  { %p340_p10 = scmp.ne.s32.totalorder %s42_s28, %s339_s7  ;;  %p345_p12 = scmp.lt.s32.totalorder %s339_s7, %s339_s7 }
  0x1b   :  { %p346_p13 = por %p345_p12, %p344_p11 }
  0x1d   :  { %p347_p0 = pnand %p346_p13, %p340_p10 }
  0x1f   :  { %350 = shalt.err (!%p347_p0)
}
  0x20   :  { %47 = dma.hbm_to_vmem [thread:$0]  %s413_s3, 512, %s42_s28, [#allocation5], %s356_s21, %s356_s21, %s357_s22  }
  0x21   :  { %351 = dma.done.wait [#allocation3], 128  }
  0x22   :  { %352 = vsyncadd [#allocation3], 4294967168 }
  0x23   :  { %353 = dma.done.wait [#allocation5], 768  }
  0x24   :  { %354 = vsyncadd [#allocation5], 4294966528  ;;  %v360_v0 = vmov 0.0   ;;  %vm361_vm0 = vmmov 0   ;;  %v281_v1 = vld [vmem:[#allocation4 + $0x8] sm:$0xff]   ;;  %v282_v2 = vld [vmem:[#allocation4] sm:$0xff]   ;;  %v214_v17 = vlaneseq }
  0x25   :  { %254 = vmatprep.subr.bf16.mxu0 %v360_v0  ;;  %258 = vmatprep.mubr.msk.bf16.mxu0 %vm361_vm0, %v360_v0  ;;  %v60_v3 = vld [vmem:[#allocation2] sm:$0xff]  ;;  %v283_v4 = vld [vmem:[#allocation6 + $0x18] sm:$0xff]   ;;  %v284_v5 = vld [vmem:[#allocation6 + $0x10] sm:$0xff]   ;;  %vm85_vm1 = vcmask 261120   ;;  %vm170_vm2 = vcmask 523264  }
  0x26   :  { %262 = vmatprep.subr.bf16.mxu1 %v360_v0  ;;  %270 = vmatprep.mubr.msk.bf16.mxu1 %vm361_vm0, %v360_v0  ;;  %v61_v6 = vpack.c.bf16 %v60_v3, %v60_v3  ;;  %v285_v7 = vld [vmem:[#allocation6 + $0x8] sm:$0xff]   ;;  %v286_v8 = vld [vmem:[#allocation6] sm:$0xff]   ;;  %v215_v18 = vand.u32 127, %v214_v17 }
  0x27   :  { %255 = vmatpush3.bf16.msra.mxu0 %v281_v1  ;;  %263 = vmatpush3.bf16.msra.mxu1 %v283_v4  ;;  %v236_v9 = vld [vmem:[%s412_s2] ss:$0 sm:$0xff] }
  0x28   :  { %256 = vmatprep.subr.bf16.mxu0 %v360_v0  ;;  %264 = vmatprep.subr.bf16.mxu1 %v360_v0  ;;  %v240_v19 = vld [vmem:[%s414_s4] ss:$0 sm:$0xff]  ;;  %vm216_vm3 = vcmp.lt.s32.totalorder %v215_v18, 10 }
  0x2b   :  { %257 = vmatpush3.bf16.msra.mxu0 %v282_v2  ;;  %265 = vmatpush3.bf16.msra.mxu1 %v284_v5 }
  0x2c   :  { %266 = vmatprep.subr.bf16.mxu1 %v360_v0 }
  0x2e   :  { %259 = vmatmul.mubr.msk.bf16.vlgmr.msra.gmra.mxu0 %vm85_vm1, %v61_v6 }
  0x2f   :  { %267 = vmatpush3.bf16.msra.mxu1 %v285_v7 }
  0x30   :  { %268 = vmatprep.subr.bf16.mxu1 %v360_v0 }
  0x33   :  { %269 = vmatpush3.bf16.msra.mxu1 %v286_v8 }
  0xee   :  { %v123_v10 = vpop.f32.mrf.mxu0 }
  0xef   :  { %v124_v11 = vadd.f32 %v236_v9, %v123_v10 }
  0xf0   :  { %v260_v12 = vpop.f32.mrf.mxu0 }
  0xf1   :  { %v129_v13 = vmax.f32 %v124_v11, 0.0 }
  0xf2   :  { %v126_v14 = vpop.f32.mrf.mxu0 }
  0xf3   :  { %v130_v15 = vpack.c.bf16 %v129_v13, %v129_v13 }
  0xf4   :  { %v261_v16 = vpop.f32.mrf.mxu0 }
  0xf5   :  { %271 = vmatmul.mubr.msk.bf16.vlgmr.msra.gmra.mxu1 %vm170_vm2, %v130_v15 }
 0x1b5   :  { %v208_v20 = vpop.f32.mrf.mxu1 }
 0x1b6   :  { %v209_v21 = vadd.f32 %v240_v19, %v208_v20 }
 0x1b7   :  { %v272_v22 = vpop.f32.mrf.mxu1 }
 0x1b8   :  { %v217_v23 = vsel %vm216_vm3, %v209_v21, -1e+30 }
 0x1b9   :  { %218 = vmax.xlane.f32.xlu0 %v217_v23  ;;  %v211_v24 = vpop.f32.mrf.mxu1 }
 0x1bb   :  { %v273_v25 = vpop.f32.mrf.mxu1 }
 0x242   :  { %v219_v26 = vpop.xlane.xlu0 %218 }
 0x243   :  { %v220_v27 = vsub.f32 %v217_v23, %v219_v26 }
 0x245   :  { %v221_v28 = vmul.f32 1.442695, %v220_v27 }
 0x247   :  { %287 = vpow2.f32 %v221_v28 }
 0x254   :  { %v288_v29 = vpop.eup %287 }
 0x255   :  { %223 = vadd.xlane.f32.xlu0 %v288_v29 }
 0x2de   :  { %v224_v30 = vpop.xlane.xlu0 %223 }
 0x2df   :  { %289 = vlog2.f32 %v224_v30 }
 0x2ec   :  { %v290_v31 = vpop.eup %289 }
 0x2ed   :  { %v226_v32 = vmul.f32 0.6931472, %v290_v31 }
 0x2ef   :  { %v227_v33 = vsub.f32 %v220_v27, %v226_v32 }
 0x2f1   :  { %v228_v34 = vpack.c.bf16 %v227_v33, %v227_v33 }
 0x2f3   :  { %229 = vst [vmem:[%s415_s5] sm:$0xf] %v228_v34 }
 0x2f4   :  { %234 = vsyncpa [#allocation3], 1 }
 0x2f5   :  { %235 = vsyncpa [#allocation5], 1 }

</bundles_post_ra>
